<compile_context>
chip_gen: v5e
topology: v5e:2x2
jax: 0.10.0
libtpu: 0.0.40
codegen_flags: <defaults>
</compile_context>

<pallas_src>
import functools
import math

import jax
import jax.numpy as jnp
from jax.experimental import pallas as pl
from jax.experimental.pallas import tpu as pltpu

EPS = 1e-6
VMEM_LIMIT = 64 * 1024 * 1024   # fits every generation (v7x physical VMEM = 64 MiB)


# ------------------------------ helpers -------------------------------------

def _layernorm(x, a, b, eps, approx):
    # Matches torch: unbiased std (divide by D-1), eps added to std (not var).
    d = x.shape[-1]
    mean = jnp.mean(x, axis=-1, keepdims=True)
    xc = x - mean
    std = jnp.sqrt(jnp.sum(xc * xc, axis=-1, keepdims=True) * (1.0 / (d - 1)))
    return a * xc * pl.reciprocal(std + eps, approx=approx) + b


def _pick_tile(n, cap=512):
    for t in (512, 256, 128, 64, 32, 16, 8):
        if t <= cap and n % t == 0:
            return t
    return n


def _pick_dff_tile(dff, cap=2048):
    if dff <= cap:
        return dff
    for t in (2048, 1024, 512, 256, 128):
        if dff % t == 0:
            return t
    return dff


# --------------------------- fused Pallas kernels ----------------------------

def _attn_sublayer_kernel(*refs, h, eps, scale, cross, tq, approx):
    """x + Wo( MHA( LN(x), kv_src, kv_src, mask ) ), one (batch, q-tile) block."""
    if cross:
        (x_ref, src_ref, mask_ref, a_ref, b_ref,
         wq_ref, bq_ref, wkv_ref, bkv_ref, wo_ref, bo_ref, o_ref) = refs
    else:
        (x_ref, mask_ref, a_ref, b_ref,
         wq_ref, bq_ref, wkv_ref, bkv_ref, wo_ref, bo_ref, o_ref) = refs

    md = wq_ref.dtype                 # MXU-input dtype (bf16 fast / f32 strict)
    a = a_ref[...]
    b = b_ref[...]

    if cross:
        x_tile = x_ref[0]                               # [tq, D] query rows
        kv_in = src_ref[0]                              # [S, D] memory, no LN
        xn_q = _layernorm(x_tile, a, b, eps, approx)
    else:
        x_full = x_ref[0]                               # [T, D]
        xn_full = _layernorm(x_full, a, b, eps, approx)
        kv_in = xn_full                                 # K/V from LN(x)
        if x_full.shape[0] == tq:                       # single query tile
            x_tile = x_full
            xn_q = xn_full
        else:
            row0 = pl.multiple_of(pl.program_id(1) * tq, tq)
            x_tile = x_ref[0, pl.ds(row0, tq), :]
            xn_q = _layernorm(x_tile, a, b, eps, approx)

    D = x_tile.shape[-1]
    dk = D // h

    # --- projections: one [tq,D]@[D,D] for Q, one [S,D]@[D,2D] for K|V ------
    q = jnp.dot(xn_q.astype(md), wq_ref[...],
                preferred_element_type=jnp.float32) + bq_ref[...]
    kv = jnp.dot(kv_in.astype(md), wkv_ref[...],
                 preferred_element_type=jnp.float32) + bkv_ref[...]

    # fold 1/sqrt(dk) into Q once (cheaper than scaling [h,tq,S] scores)
    qm = (q * scale).astype(md)
    kvm = kv.astype(md)

    # --- heads gathered once into [h, *, dk]; all attention math is batched --
    qh = jnp.stack([qm[:, i * dk:(i + 1) * dk] for i in range(h)], axis=0)
    kh = jnp.stack([kvm[:, i * dk:(i + 1) * dk] for i in range(h)], axis=0)
    vh = jnp.stack([kvm[:, D + i * dk:D + (i + 1) * dk] for i in range(h)], axis=0)

    s = jnp.einsum('hqd,hsd->hqs', qh, kh,
                   preferred_element_type=jnp.float32)          # [h, tq, S]
    # single mask compare, shared by all heads (exact masked_fill semantics)
    s = jnp.where(mask_ref[0][None] == 0.0, -1e9, s)
    s = s - jnp.max(s, axis=-1, keepdims=True)
    p = jnp.exp(s)
    p = p * pl.reciprocal(jnp.sum(p, axis=-1, keepdims=True), approx=approx)

    oh = jnp.einsum('hqs,hsd->hqd', p.astype(md), vh,
                    preferred_element_type=jnp.float32)          # [h, tq, dk]

    # output projection with head-major Wo ([h, dk, D]); summing over heads ==
    # concat(heads) @ Wo, but never concatenates along the lane axis.
    out = jnp.sum(jnp.einsum('hqd,hdn->hqn', oh.astype(md), wo_ref[...],
                             preferred_element_type=jnp.float32), axis=0)
    o_ref[0] = x_tile + out + bo_ref[...]


def _ffn_sublayer_kernel(x_ref, a_ref, b_ref, w1_ref, b1_ref, w2_ref, b2_ref,
                         o_ref, xn_ref, *, eps, approx):
    """x + W2 relu(W1 LN(x) + b1) + b2, tiled over the DFF contraction."""
    md = w1_ref.dtype
    k = pl.program_id(1)

    @pl.when(k == 0)
    def _():
        x = x_ref[...]
        xn_ref[...] = _layernorm(x, a_ref[...], b_ref[...], eps,
                                 approx).astype(xn_ref.dtype)
        o_ref[...] = x + b2_ref[...]          # residual + final bias up front

    h1 = jnp.dot(xn_ref[...], w1_ref[...],
                 preferred_element_type=jnp.float32) + b1_ref[...]
    h1 = jnp.maximum(h1, 0.0)
    o_ref[...] += jnp.dot(h1.astype(md), w2_ref[...],
                          preferred_element_type=jnp.float32)


# --------------------------- pallas_call wrappers ----------------------------

def attn_sublayer(x, src, mask, ln, attn_p, *, h, cross, eps=EPS, approx=True,
                  vmem_limit=VMEM_LIMIT):
    B, T, D = x.shape
    S = src.shape[1] if cross else T
    dk = D // h
    scale = 1.0 / math.sqrt(dk)
    tq = _pick_tile(T, cap=256)
    nq = T // tq

    mask = mask.astype(jnp.float32)          # original [1|B, 1|T, S]; NOT broadcast
    bcast_b = mask.shape[0] != B
    bcast_t = mask.shape[1] != T
    mq = 1 if bcast_t else tq

    def mask_map(bi, ji, _bb=bcast_b, _bt=bcast_t):
        return (0 if _bb else bi, 0 if _bt else ji, 0)

    const2 = lambda bi, ji: (0, 0)
    const3 = lambda bi, ji: (0, 0, 0)

    if cross:
        x_spec = pl.BlockSpec((1, tq, D), lambda bi, ji: (bi, ji, 0))
    else:
        x_spec = pl.BlockSpec((1, T, D), lambda bi, ji: (bi, 0, 0))

    in_specs = [x_spec]
    args = [x]
    if cross:
        in_specs.append(pl.BlockSpec((1, S, D), lambda bi, ji: (bi, 0, 0)))
        args.append(src)
    in_specs += [
        pl.BlockSpec((1, mq, S), mask_map),     # mask (broadcast in-kernel)
        pl.BlockSpec((1, D), const2),           # ln a
        pl.BlockSpec((1, D), const2),           # ln b
        pl.BlockSpec((D, D), const2),           # wq
        pl.BlockSpec((1, D), const2),           # bq
        pl.BlockSpec((D, 2 * D), const2),       # wkv (pre-concatenated)
        pl.BlockSpec((1, 2 * D), const2),       # bkv
        pl.BlockSpec((h, dk, D), const3),       # wo, head-major
        pl.BlockSpec((1, D), const2),           # bo
    ]
    args += [mask, ln["a"], ln["b"], attn_p["wq"], attn_p["bq"],
             attn_p["wkv"], attn_p["bkv"], attn_p["wo_h"], attn_p["bo"]]

    kernel = functools.partial(_attn_sublayer_kernel, h=h, eps=eps, scale=scale,
                               cross=cross, tq=tq, approx=approx)
    return pl.pallas_call(
        kernel,
        out_shape=jax.ShapeDtypeStruct((B, T, D), jnp.float32),
        grid=(B, nq),
        in_specs=in_specs,
        out_specs=pl.BlockSpec((1, tq, D), lambda bi, ji: (bi, ji, 0)),
        compiler_params=pltpu.CompilerParams(
            dimension_semantics=("parallel", "parallel"),
            vmem_limit_bytes=vmem_limit),
    )(*args)


def ffn_sublayer(x, ln, ff_p, *, eps=EPS, approx=True, vmem_limit=VMEM_LIMIT):
    B, T, D = x.shape
    DFF = ff_p["w1"].shape[1]
    md = ff_p["w1"].dtype
    M = B * T
    tm = _pick_tile(M, cap=512)
    tdff = _pick_dff_tile(DFF)
    n_dff = DFF // tdff

    x2 = x.reshape(M, D)
    const = lambda i, k: (0, 0)
    out = pl.pallas_call(
        functools.partial(_ffn_sublayer_kernel, eps=eps, approx=approx),
        out_shape=jax.ShapeDtypeStruct((M, D), jnp.float32),
        grid=(M // tm, n_dff),
        in_specs=[pl.BlockSpec((tm, D), lambda i, k: (i, 0)),
                  pl.BlockSpec((1, D), const),                 # ln a
                  pl.BlockSpec((1, D), const),                 # ln b
                  pl.BlockSpec((D, tdff), lambda i, k: (0, k)),  # w1 tile
                  pl.BlockSpec((1, tdff), lambda i, k: (0, k)),  # b1 tile
                  pl.BlockSpec((tdff, D), lambda i, k: (k, 0)),  # w2 tile
                  pl.BlockSpec((1, D), const)],                # b2
        out_specs=pl.BlockSpec((tm, D), lambda i, k: (i, 0)),
        scratch_shapes=[pltpu.VMEM((tm, D), md)],              # cached LN(x)
        compiler_params=pltpu.CompilerParams(
            dimension_semantics=("parallel", "arbitrary"),
            vmem_limit_bytes=vmem_limit),
    )(x2, ln["a"], ln["b"], ff_p["w1"], ff_p["b1"], ff_p["w2"], ff_p["b2"])
    return out.reshape(B, T, D)


# ------------------------------- model glue ----------------------------------

def prepare_params(params, h, matmul_dtype=jnp.bfloat16):
    """One-time conversion to kernel-ready params: K|V pre-concatenated, Wo
    reshaped head-major, matmul weights cast to matmul_dtype; LN params and
    biases stay f32. Do this once, outside the per-step call."""
    f32 = jnp.float32

    def ln(p):
        a, b = p
        return {"a": a.reshape(1, -1).astype(f32),
                "b": b.reshape(1, -1).astype(f32)}

    def attn(p):
        wq, bq = p["wq"]; wk, bk = p["wk"]; wv, bv = p["wv"]; wo, bo = p["wo"]
        D = wq.shape[0]
        dk = D // h
        return {
            "wq": wq.astype(matmul_dtype),
            "bq": bq.reshape(1, D).astype(f32),
            "wkv": jnp.concatenate([wk, wv], axis=1).astype(matmul_dtype),
            "bkv": jnp.concatenate([bk, bv]).reshape(1, 2 * D).astype(f32),
            "wo_h": wo.reshape(h, dk, D).astype(matmul_dtype),
            "bo": bo.reshape(1, D).astype(f32),
        }

    def ff(p):
        (w1, b1), (w2, b2) = p["w1"], p["w2"]
        return {"w1": w1.astype(matmul_dtype), "b1": b1.reshape(1, -1).astype(f32),
                "w2": w2.astype(matmul_dtype), "b2": b2.reshape(1, -1).astype(f32)}

    return {"ln0": ln(params["ln0"]), "ln1": ln(params["ln1"]),
            "ln2": ln(params["ln2"]), "self_attn": attn(params["self_attn"]),
            "src_attn": attn(params["src_attn"]), "ff": ff(params["ff"])}


def decoder_layer(prepared, x, memory, src_mask, tgt_mask, h, *, approx=True):
    # Dropout is identity (eval mode), as in the reference forward.
    x = attn_sublayer(x, None, tgt_mask, prepared["ln0"], prepared["self_attn"],
                      h=h, cross=False, approx=approx)
    x = attn_sublayer(x, memory, src_mask, prepared["ln1"], prepared["src_attn"],
                      h=h, cross=True, approx=approx)
    return ffn_sublayer(x, prepared["ln2"], prepared["ff"], approx=approx)


# ------------------------------ pure-JAX ref ----------------------------------

def _ref_layernorm(x, a, b, eps=EPS):
    mean = x.mean(-1, keepdims=True)
    std = jnp.sqrt(jnp.sum((x - mean) ** 2, -1, keepdims=True) / (x.shape[-1] - 1))
    return a * (x - mean) / (std + eps) + b


def _ref_mha(p, q_in, k_in, v_in, mask, h):
    B, T, D = q_in.shape
    dk = D // h

    def proj(pp, x):
        return (x @ pp[0] + pp[1]).reshape(x.shape[0], x.shape[1], h, dk).transpose(0, 2, 1, 3)

    q, k, v = proj(p["wq"], q_in), proj(p["wk"], k_in), proj(p["wv"], v_in)
    s = jnp.einsum("bhtd,bhsd->bhts", q, k) / math.sqrt(dk)
    s = jnp.where(mask[:, None] == 0, -1e9, s)
    a = jax.nn.softmax(s, axis=-1)
    o = jnp.einsum("bhts,bhsd->bhtd", a, v).transpose(0, 2, 1, 3).reshape(B, T, D)
    return o @ p["wo"][0] + p["wo"][1]


def _ref_decoder(params, x, memory, src_mask, tgt_mask, h):
    xn = _ref_layernorm(x, params["ln0"][0], params["ln0"][1])
    x = x + _ref_mha(params["self_attn"], xn, xn, xn, tgt_mask, h)
    xn = _ref_layernorm(x, params["ln1"][0], params["ln1"][1])
    x = x + _ref_mha(params["src_attn"], xn, memory, memory, src_mask, h)
    xn = _ref_layernorm(x, params["ln2"][0], params["ln2"][1])
    ff = jnp.maximum(xn @ params["ff"]["w1"][0] + params["ff"]["w1"][1], 0.0)
    return x + (ff @ params["ff"]["w2"][0] + params["ff"]["w2"][1])


# ---------------------------------- main --------------------------------------

def _init_linear(key, din, dout):
    k1, k2 = jax.random.split(key)
    return (jax.random.normal(k1, (din, dout), jnp.float32) * 0.02,
            jax.random.normal(k2, (dout,), jnp.float32) * 0.02)


if __name__ == "__main__":
    B, T, S, D, H, DFF = 2, 8, 8, 32, 4, 64
    key = jax.random.PRNGKey(0)
    keys = jax.random.split(key, 16)

    def mha_params(ks):
        return {"wq": _init_linear(ks[0], D, D), "wk": _init_linear(ks[1], D, D),
                "wv": _init_linear(ks[2], D, D), "wo": _init_linear(ks[3], D, D)}

    params = {
        "ln0": (jnp.ones((D,), jnp.float32), jnp.zeros((D,), jnp.float32)),
        "ln1": (jnp.ones((D,), jnp.float32), jnp.zeros((D,), jnp.float32)),
        "ln2": (jnp.ones((D,), jnp.float32), jnp.zeros((D,), jnp.float32)),
        "self_attn": mha_params(keys[0:4]),
        "src_attn": mha_params(keys[4:8]),
        "ff": {"w1": _init_linear(keys[8], D, DFF), "w2": _init_linear(keys[9], DFF, D)},
    }

    x = jax.random.normal(keys[10], (B, T, D), jnp.float32)
    memory = jax.random.normal(keys[11], (B, S, D), jnp.float32)
    tgt_mask = jnp.tril(jnp.ones((1, T, T), jnp.float32))   # causal (subsequent_mask)
    src_mask = jnp.ones((1, 1, S), jnp.float32)

    ref = _ref_decoder(params, x, memory, src_mask, tgt_mask, H)

    # Strict path: f32 MXU inputs + exact reciprocals (tight numerical check).
    strict = decoder_layer(prepare_params(params, H, jnp.float32),
                           x, memory, src_mask, tgt_mask, H, approx=False)
    strict = jax.block_until_ready(strict)
    assert strict.shape == (B, T, D)
    assert jnp.allclose(strict, ref, atol=2e-4, rtol=2e-4), "f32 path mismatch vs JAX reference"

    # Production path: bf16 MXU inputs (f32 accumulate) + EUP approx reciprocals.
    fast = decoder_layer(prepare_params(params, H, jnp.bfloat16),
                         x, memory, src_mask, tgt_mask, H, approx=True)
    fast = jax.block_until_ready(fast)
    assert jnp.allclose(fast, ref, atol=2e-2, rtol=2e-2), "bf16 path mismatch vs JAX reference"

    print("KERNEL_OK")
</pallas_src>

<mosaic_0001>
module attributes {stable_mosaic.version = 11 : i64} {
  func.func @_attn_sublayer_kernel(%arg0: i32, %arg1: i32, %arg2: memref<1x8x32xf32, #tpu.memory_space<vmem>>, %arg3: memref<1x8x8xf32, #tpu.memory_space<vmem>>, %arg4: memref<1x32xf32, #tpu.memory_space<vmem>>, %arg5: memref<1x32xf32, #tpu.memory_space<vmem>>, %arg6: memref<32x32xf32, #tpu.memory_space<vmem>>, %arg7: memref<1x32xf32, #tpu.memory_space<vmem>>, %arg8: memref<32x64xf32, #tpu.memory_space<vmem>>, %arg9: memref<1x64xf32, #tpu.memory_space<vmem>>, %arg10: memref<4x8x32xf32, #tpu.memory_space<vmem>>, %arg11: memref<1x32xf32, #tpu.memory_space<vmem>>, %arg12: memref<1x8x32xf32, #tpu.memory_space<vmem>>) attributes {dimension_semantics = [#tpu.dimension_semantics<parallel>, #tpu.dimension_semantics<parallel>], iteration_bounds = array<i64: 2, 1>, scalar_prefetch = 0 : i64, scratch_operands = 0 : i64, tpu.core_type = #tpu.core_type<tc>, window_params = [{transform_indices = @transform_0, window_bounds = array<i64: 1, 8, 32>}, {transform_indices = @transform_1, window_bounds = array<i64: 1, 8, 8>}, {pipeline_mode = #tpu.pipeline_mode<synchronous>, transform_indices = @transform_2, window_bounds = array<i64: 1, 32>}, {pipeline_mode = #tpu.pipeline_mode<synchronous>, transform_indices = @transform_3, window_bounds = array<i64: 1, 32>}, {pipeline_mode = #tpu.pipeline_mode<synchronous>, transform_indices = @transform_4, window_bounds = array<i64: 32, 32>}, {pipeline_mode = #tpu.pipeline_mode<synchronous>, transform_indices = @transform_5, window_bounds = array<i64: 1, 32>}, {pipeline_mode = #tpu.pipeline_mode<synchronous>, transform_indices = @transform_6, window_bounds = array<i64: 32, 64>}, {pipeline_mode = #tpu.pipeline_mode<synchronous>, transform_indices = @transform_7, window_bounds = array<i64: 1, 64>}, {pipeline_mode = #tpu.pipeline_mode<synchronous>, transform_indices = @transform_8, window_bounds = array<i64: 4, 8, 32>}, {pipeline_mode = #tpu.pipeline_mode<synchronous>, transform_indices = @transform_9, window_bounds = array<i64: 1, 32>}, {transform_indices = @transform_10, window_bounds = array<i64: 1, 8, 32>}]} {
    %c0 = arith.constant 0 : index
    %c0_0 = arith.constant 0 : index
    %0 = vector.load %arg4[%c0, %c0_0] : memref<1x32xf32, #tpu.memory_space<vmem>>, vector<1x32xf32>
    %c0_1 = arith.constant 0 : index
    %c0_2 = arith.constant 0 : index
    %1 = vector.load %arg5[%c0_1, %c0_2] : memref<1x32xf32, #tpu.memory_space<vmem>>, vector<1x32xf32>
    %c0_3 = arith.constant 0 : index
    %c0_4 = arith.constant 0 : index
    %c0_5 = arith.constant 0 : index
    %2 = vector.load %arg2[%c0_3, %c0_4, %c0_5] : memref<1x8x32xf32, #tpu.memory_space<vmem>>, vector<1x8x32xf32>
    %3 = vector.shape_cast %2 : vector<1x8x32xf32> to vector<8x32xf32>
    %cst = arith.constant dense<0.000000e+00> : vector<8xf32>
    %4 = vector.multi_reduction <add>, %3, %cst [1] : vector<8x32xf32> to vector<8xf32>
    %5 = vector.shape_cast %4 : vector<8xf32> to vector<8x1xf32>
    %cst_6 = arith.constant 3.200000e+01 : f32
    %6 = vector.broadcast %cst_6 : f32 to vector<8x1xf32>
    %7 = arith.divf %5, %6 : vector<8x1xf32>
    %8 = vector.broadcast %7 : vector<8x1xf32> to vector<8x32xf32>
    %9 = arith.subf %3, %8 : vector<8x32xf32>
    %10 = arith.mulf %9, %9 : vector<8x32xf32>
    %cst_7 = arith.constant dense<0.000000e+00> : vector<8xf32>
    %11 = vector.multi_reduction <add>, %10, %cst_7 [1] : vector<8x32xf32> to vector<8xf32>
    %12 = vector.shape_cast %11 : vector<8xf32> to vector<8x1xf32>
    %cst_8 = arith.constant 0.0322580636 : f32
    %13 = vector.broadcast %cst_8 : f32 to vector<8x1xf32>
    %14 = arith.mulf %12, %13 : vector<8x1xf32>
    %15 = math.sqrt %14 : vector<8x1xf32>
    %16 = vector.broadcast %0 : vector<1x32xf32> to vector<8x32xf32>
    %17 = arith.mulf %16, %9 : vector<8x32xf32>
    %cst_9 = arith.constant 9.99999997E-7 : f32
    %18 = vector.broadcast %cst_9 : f32 to vector<8x1xf32>
    %19 = arith.addf %15, %18 : vector<8x1xf32>
    %20 = tpu.reciprocal %19 : vector<8x1xf32> -> vector<8x1xf32>
    %21 = vector.broadcast %20 : vector<8x1xf32> to vector<8x32xf32>
    %22 = arith.mulf %17, %21 : vector<8x32xf32>
    %23 = vector.broadcast %1 : vector<1x32xf32> to vector<8x32xf32>
    %24 = arith.addf %22, %23 : vector<8x32xf32>
    %c0_10 = arith.constant 0 : index
    %c0_11 = arith.constant 0 : index
    %25 = vector.load %arg6[%c0_10, %c0_11] : memref<32x32xf32, #tpu.memory_space<vmem>>, vector<32x32xf32>
    %cst_12 = arith.constant dense<0.000000e+00> : vector<8x32xf32>
    %26 = tpu.matmul %24, %25, %cst_12 {dimension_numbers = #tpu.dot_dimension_numbers<[1], [0], [0], [1], [0, 0, 1, 1], [], []>} : vector<8x32xf32>, vector<32x32xf32>, vector<8x32xf32> -> vector<8x32xf32>
    %c0_13 = arith.constant 0 : index
    %c0_14 = arith.constant 0 : index
    %27 = vector.load %arg7[%c0_13, %c0_14] : memref<1x32xf32, #tpu.memory_space<vmem>>, vector<1x32xf32>
    %28 = vector.broadcast %27 : vector<1x32xf32> to vector<8x32xf32>
    %29 = arith.addf %26, %28 : vector<8x32xf32>
    %c0_15 = arith.constant 0 : index
    %c0_16 = arith.constant 0 : index
    %30 = vector.load %arg8[%c0_15, %c0_16] : memref<32x64xf32, #tpu.memory_space<vmem>>, vector<32x64xf32>
    %cst_17 = arith.constant dense<0.000000e+00> : vector<8x64xf32>
    %31 = tpu.matmul %24, %30, %cst_17 {dimension_numbers = #tpu.dot_dimension_numbers<[1], [0], [0], [1], [0, 0, 1, 1], [], []>} : vector<8x32xf32>, vector<32x64xf32>, vector<8x64xf32> -> vector<8x64xf32>
    %c0_18 = arith.constant 0 : index
    %c0_19 = arith.constant 0 : index
    %32 = vector.load %arg9[%c0_18, %c0_19] : memref<1x64xf32, #tpu.memory_space<vmem>>, vector<1x64xf32>
    %33 = vector.broadcast %32 : vector<1x64xf32> to vector<8x64xf32>
    %34 = arith.addf %31, %33 : vector<8x64xf32>
    %cst_20 = arith.constant 0.353553385 : f32
    %35 = vector.broadcast %cst_20 : f32 to vector<8x32xf32>
    %36 = arith.mulf %29, %35 : vector<8x32xf32>
    %37 = vector.extract_strided_slice %36 {offsets = [0, 0], sizes = [8, 8], strides = [1, 1]} : vector<8x32xf32> to vector<8x8xf32>
    %38 = vector.extract_strided_slice %36 {offsets = [0, 8], sizes = [8, 8], strides = [1, 1]} : vector<8x32xf32> to vector<8x8xf32>
    %39 = vector.extract_strided_slice %36 {offsets = [0, 16], sizes = [8, 8], strides = [1, 1]} : vector<8x32xf32> to vector<8x8xf32>
    %40 = vector.extract_strided_slice %36 {offsets = [0, 24], sizes = [8, 8], strides = [1, 1]} : vector<8x32xf32> to vector<8x8xf32>
    %41 = vector.shape_cast %37 : vector<8x8xf32> to vector<1x8x8xf32>
    %42 = vector.shape_cast %38 : vector<8x8xf32> to vector<1x8x8xf32>
    %43 = vector.shape_cast %39 : vector<8x8xf32> to vector<1x8x8xf32>
    %44 = vector.shape_cast %40 : vector<8x8xf32> to vector<1x8x8xf32>
    %45 = tpu.concatenate %41, %42, %43, %44 in 0 : vector<1x8x8xf32>, vector<1x8x8xf32>, vector<1x8x8xf32>, vector<1x8x8xf32> -> vector<4x8x8xf32>
    %46 = vector.extract_strided_slice %34 {offsets = [0, 0], sizes = [8, 8], strides = [1, 1]} : vector<8x64xf32> to vector<8x8xf32>
    %47 = vector.extract_strided_slice %34 {offsets = [0, 8], sizes = [8, 8], strides = [1, 1]} : vector<8x64xf32> to vector<8x8xf32>
    %48 = vector.extract_strided_slice %34 {offsets = [0, 16], sizes = [8, 8], strides = [1, 1]} : vector<8x64xf32> to vector<8x8xf32>
    %49 = vector.extract_strided_slice %34 {offsets = [0, 24], sizes = [8, 8], strides = [1, 1]} : vector<8x64xf32> to vector<8x8xf32>
    %50 = vector.shape_cast %46 : vector<8x8xf32> to vector<1x8x8xf32>
    %51 = vector.shape_cast %47 : vector<8x8xf32> to vector<1x8x8xf32>
    %52 = vector.shape_cast %48 : vector<8x8xf32> to vector<1x8x8xf32>
    %53 = vector.shape_cast %49 : vector<8x8xf32> to vector<1x8x8xf32>
    %54 = tpu.concatenate %50, %51, %52, %53 in 0 : vector<1x8x8xf32>, vector<1x8x8xf32>, vector<1x8x8xf32>, vector<1x8x8xf32> -> vector<4x8x8xf32>
    %55 = vector.extract_strided_slice %34 {offsets = [0, 32], sizes = [8, 8], strides = [1, 1]} : vector<8x64xf32> to vector<8x8xf32>
    %56 = vector.extract_strided_slice %34 {offsets = [0, 40], sizes = [8, 8], strides = [1, 1]} : vector<8x64xf32> to vector<8x8xf32>
    %57 = vector.extract_strided_slice %34 {offsets = [0, 48], sizes = [8, 8], strides = [1, 1]} : vector<8x64xf32> to vector<8x8xf32>
    %58 = vector.extract_strided_slice %34 {offsets = [0, 56], sizes = [8, 8], strides = [1, 1]} : vector<8x64xf32> to vector<8x8xf32>
    %59 = vector.shape_cast %55 : vector<8x8xf32> to vector<1x8x8xf32>
    %60 = vector.shape_cast %56 : vector<8x8xf32> to vector<1x8x8xf32>
    %61 = vector.shape_cast %57 : vector<8x8xf32> to vector<1x8x8xf32>
    %62 = vector.shape_cast %58 : vector<8x8xf32> to vector<1x8x8xf32>
    %63 = tpu.concatenate %59, %60, %61, %62 in 0 : vector<1x8x8xf32>, vector<1x8x8xf32>, vector<1x8x8xf32>, vector<1x8x8xf32> -> vector<4x8x8xf32>
    "tpu.trace_start"() <{level = 10 : i32, message = "hqd,hsd->hqs"}> : () -> ()
    %cst_21 = arith.constant dense<0.000000e+00> : vector<4x8x8xf32>
    %64 = tpu.matmul %45, %54, %cst_21 {dimension_numbers = #tpu.dot_dimension_numbers<[2], [2], [1], [1], [0, 0, 0, 1, 1, 1], [0], [0]>} : vector<4x8x8xf32>, vector<4x8x8xf32>, vector<4x8x8xf32> -> vector<4x8x8xf32>
    "tpu.trace_stop"() : () -> ()
    %c0_22 = arith.constant 0 : index
    %c0_23 = arith.constant 0 : index
    %c0_24 = arith.constant 0 : index
    %65 = vector.load %arg3[%c0_22, %c0_23, %c0_24] : memref<1x8x8xf32, #tpu.memory_space<vmem>>, vector<1x8x8xf32>
    %66 = vector.shape_cast %65 : vector<1x8x8xf32> to vector<8x8xf32>
    %67 = vector.shape_cast %66 : vector<8x8xf32> to vector<1x8x8xf32>
    %cst_25 = arith.constant 0.000000e+00 : f32
    %68 = vector.broadcast %cst_25 : f32 to vector<1x8x8xf32>
    %69 = arith.cmpf oeq, %67, %68 : vector<1x8x8xf32>
    %cst_26 = arith.constant -1.000000e+09 : f32
    %70 = vector.shape_cast %69 : vector<1x8x8xi1> to vector<1x8x8xi1>
    %71 = vector.broadcast %70 : vector<1x8x8xi1> to vector<4x8x8xi1>
    %72 = vector.broadcast %cst_26 : f32 to vector<4x8x8xf32>
    %73 = arith.select %71, %72, %64 : vector<4x8x8xi1>, vector<4x8x8xf32>
    %cst_27 = arith.constant dense<0xFF800000> : vector<4x8xf32>
    %74 = vector.multi_reduction <maximumf>, %73, %cst_27 [2] : vector<4x8x8xf32> to vector<4x8xf32>
    %75 = vector.shape_cast %74 : vector<4x8xf32> to vector<4x8x1xf32>
    %76 = vector.broadcast %75 : vector<4x8x1xf32> to vector<4x8x8xf32>
    %77 = arith.subf %73, %76 : vector<4x8x8xf32>
    %78 = math.exp %77 : vector<4x8x8xf32>
    %cst_28 = arith.constant dense<0.000000e+00> : vector<4x8xf32>
    %79 = vector.multi_reduction <add>, %78, %cst_28 [2] : vector<4x8x8xf32> to vector<4x8xf32>
    %80 = vector.shape_cast %79 : vector<4x8xf32> to vector<4x8x1xf32>
    %81 = tpu.reciprocal %80 : vector<4x8x1xf32> -> vector<4x8x1xf32>
    %82 = vector.broadcast %81 : vector<4x8x1xf32> to vector<4x8x8xf32>
    %83 = arith.mulf %78, %82 : vector<4x8x8xf32>
    "tpu.trace_start"() <{level = 10 : i32, message = "hqs,hsd->hqd"}> : () -> ()
    %cst_29 = arith.constant dense<0.000000e+00> : vector<4x8x8xf32>
    %84 = tpu.matmul %83, %63, %cst_29 {dimension_numbers = #tpu.dot_dimension_numbers<[2], [1], [1], [2], [0, 0, 0, 1, 1, 2], [0], [0]>} : vector<4x8x8xf32>, vector<4x8x8xf32>, vector<4x8x8xf32> -> vector<4x8x8xf32>
    "tpu.trace_stop"() : () -> ()
    %c0_30 = arith.constant 0 : index
    %c0_31 = arith.constant 0 : index
    %c0_32 = arith.constant 0 : index
    %85 = vector.load %arg10[%c0_30, %c0_31, %c0_32] : memref<4x8x32xf32, #tpu.memory_space<vmem>>, vector<4x8x32xf32>
    "tpu.trace_start"() <{level = 10 : i32, message = "hqd,hdn->hqn"}> : () -> ()
    %cst_33 = arith.constant dense<0.000000e+00> : vector<4x8x32xf32>
    %86 = tpu.matmul %84, %85, %cst_33 {dimension_numbers = #tpu.dot_dimension_numbers<[2], [1], [1], [2], [0, 0, 0, 1, 1, 2], [0], [0]>} : vector<4x8x8xf32>, vector<4x8x32xf32>, vector<4x8x32xf32> -> vector<4x8x32xf32>
    "tpu.trace_stop"() : () -> ()
    %cst_34 = arith.constant dense<0.000000e+00> : vector<8x32xf32>
    %87 = vector.multi_reduction <add>, %86, %cst_34 [0] : vector<4x8x32xf32> to vector<8x32xf32>
    %88 = arith.addf %3, %87 : vector<8x32xf32>
    %c0_35 = arith.constant 0 : index
    %c0_36 = arith.constant 0 : index
    %89 = vector.load %arg11[%c0_35, %c0_36] : memref<1x32xf32, #tpu.memory_space<vmem>>, vector<1x32xf32>
    %90 = vector.broadcast %89 : vector<1x32xf32> to vector<8x32xf32>
    %91 = arith.addf %88, %90 : vector<8x32xf32>
    %c0_37 = arith.constant 0 : index
    %c0_38 = arith.constant 0 : index
    %c0_39 = arith.constant 0 : index
    %92 = vector.load %arg12[%c0_37, %c0_38, %c0_39] : memref<1x8x32xf32, #tpu.memory_space<vmem>>, vector<1x8x32xf32>
    %93 = vector.shape_cast %92 : vector<1x8x32xf32> to vector<8x32xf32>
    %94 = vector.shape_cast %91 : vector<8x32xf32> to vector<1x8x32xf32>
    tpu.vector_store %arg12[%c0_37, %c0_38, %c0_39], %94 {strides = array<i32>} : memref<1x8x32xf32, #tpu.memory_space<vmem>>, vector<1x8x32xf32>,
    return
  }
  func.func @transform_0(%arg0: i32, %arg1: i32) -> (i32, i32, i32) {
    %c0_i32 = arith.constant 0 : i32
    %c0_i32_0 = arith.constant 0 : i32
    %c0_i32_1 = arith.constant 0 : i32
    return %arg0, %c0_i32, %c0_i32_0 : i32, i32, i32
  }
  func.func @transform_1(%arg0: i32, %arg1: i32) -> (i32, i32, i32) {
    %c0_i32 = arith.constant 0 : i32
    %c0_i32_0 = arith.constant 0 : i32
    %c0_i32_1 = arith.constant 0 : i32
    return %c0_i32, %arg1, %c0_i32_0 : i32, i32, i32
  }
  func.func @transform_2(%arg0: i32, %arg1: i32) -> (i32, i32) {
    %c0_i32 = arith.constant 0 : i32
    %c0_i32_0 = arith.constant 0 : i32
    %c0_i32_1 = arith.constant 0 : i32
    return %c0_i32, %c0_i32_0 : i32, i32
  }
  func.func @transform_3(%arg0: i32, %arg1: i32) -> (i32, i32) {
    %c0_i32 = arith.constant 0 : i32
    %c0_i32_0 = arith.constant 0 : i32
    %c0_i32_1 = arith.constant 0 : i32
    return %c0_i32, %c0_i32_0 : i32, i32
  }
  func.func @transform_4(%arg0: i32, %arg1: i32) -> (i32, i32) {
    %c0_i32 = arith.constant 0 : i32
    %c0_i32_0 = arith.constant 0 : i32
    %c0_i32_1 = arith.constant 0 : i32
    return %c0_i32, %c0_i32_0 : i32, i32
  }
  func.func @transform_5(%arg0: i32, %arg1: i32) -> (i32, i32) {
    %c0_i32 = arith.constant 0 : i32
    %c0_i32_0 = arith.constant 0 : i32
    %c0_i32_1 = arith.constant 0 : i32
    return %c0_i32, %c0_i32_0 : i32, i32
  }
  func.func @transform_6(%arg0: i32, %arg1: i32) -> (i32, i32) {
    %c0_i32 = arith.constant 0 : i32
    %c0_i32_0 = arith.constant 0 : i32
    %c0_i32_1 = arith.constant 0 : i32
    return %c0_i32, %c0_i32_0 : i32, i32
  }
  func.func @transform_7(%arg0: i32, %arg1: i32) -> (i32, i32) {
    %c0_i32 = arith.constant 0 : i32
    %c0_i32_0 = arith.constant 0 : i32
    %c0_i32_1 = arith.constant 0 : i32
    return %c0_i32, %c0_i32_0 : i32, i32
  }
  func.func @transform_8(%arg0: i32, %arg1: i32) -> (i32, i32, i32) {
    %c0_i32 = arith.constant 0 : i32
    %c0_i32_0 = arith.constant 0 : i32
    %c0_i32_1 = arith.constant 0 : i32
    %c0_i32_2 = arith.constant 0 : i32
    return %c0_i32, %c0_i32_0, %c0_i32_1 : i32, i32, i32
  }
  func.func @transform_9(%arg0: i32, %arg1: i32) -> (i32, i32) {
    %c0_i32 = arith.constant 0 : i32
    %c0_i32_0 = arith.constant 0 : i32
    %c0_i32_1 = arith.constant 0 : i32
    return %c0_i32, %c0_i32_0 : i32, i32
  }
  func.func @transform_10(%arg0: i32, %arg1: i32) -> (i32, i32, i32) {
    %c0_i32 = arith.constant 0 : i32
    %c0_i32_0 = arith.constant 0 : i32
    return %arg0, %arg1, %c0_i32 : i32, i32, i32
  }
}

</mosaic_0001>

<bundles_post_ra>
// kernel: tpu_custom_call.1
= control target key start
LH: loop header
LB: loop body
LE: loop exit
PB: predicated region body
PF: predicated region fallthrough
CT: control target
= control target key end

     0   :  { %s1886_s0 = inlined_call_operand.hbm [shape: f32[2,8,32], index: 0, kind: input, shape index: {}]   ;;  %s1887_s1 = inlined_call_operand.hbm [shape: f32[1,8,8], index: 1, kind: input, shape index: {}]   ;;  %s1888_s2 = inlined_call_operand.vmem [shape: f32[1,32], index: 2, kind: input, shape index: {}]   ;;  %s1889_s3 = inlined_call_operand.vmem [shape: f32[1,32], index: 3, kind: input, shape index: {}]   ;;  %s1890_s4 = inlined_call_operand.hbm [shape: f32[32,32], index: 4, kind: input, shape index: {}]   ;;  %s1891_s5 = inlined_call_operand.vmem [shape: f32[1,32], index: 5, kind: input, shape index: {}]   ;;  %s1892_s6 = inlined_call_operand.hbm [shape: f32[32,64], index: 6, kind: input, shape index: {}]   ;;  %s1893_s7 = inlined_call_operand.vmem [shape: f32[1,64], index: 7, kind: input, shape index: {}]   ;;  %s1894_s8 = inlined_call_operand.hbm [shape: f32[4,8,32], index: 8, kind: input, shape index: {}]   ;;  %s1895_s9 = inlined_call_operand.vmem [shape: f32[1,32], index: 9, kind: input, shape index: {}]   ;;  %s1896_s10 = inlined_call_operand.hbm [shape: f32[2,8,32], index: 10, kind: output, shape index: {}]  }
   0x1   :  { %1898 = sst [smem:[#allocation16_spill]] %s1887_s1 }
   0x2   :  { %1899 = sst [smem:[#allocation17_spill]] %s1890_s4 }
   0x3   :  { %1900 = sst [smem:[#allocation18_spill]] %s1892_s6 }
   0x4   :  { %1901 = sst [smem:[#allocation19_spill]] %s1894_s8 }
   0x5   :  { %15 = vsyncpa [#allocation3], 0 }
   0x6   :  { %17 = vsyncpa [#allocation3 + $0x1], 0 }
   0x7   :  { %18 = vsyncpa [#allocation6], 0 }
   0x8   :  { %19 = vsyncpa [#allocation9], 0 }
   0x9   :  { %20 = vsyncpa [#allocation4], 0 }
   0xa   :  { %22 = vsyncpa [#allocation4 + $0x1], 0  ;;  %s1638_s13 = smov 0   ;;  %s1640_s14 = smov 0  }
   0xb   :  { %s1642_s15 = smov 0   ;;  %s1644_s16 = smov 0  }
   0xc   :  { %s1646_s17 = smov 0   ;;  %s1648_s18 = smov 0  }
   0xd LB: > { %s1897_s19 = sadd.s32 4294967295, %s1570_s18   ;;  %p1146_p0 = scmp.ge.s32.totalorder %s1570_s18, 1  ;;  %s1570_s18 = sphi %s1648_s18, %s28_s18   ;;  %s1566_s17 = sphi %s1646_s17, %s1917_s17   ;;  %s1562_s16 = sphi %s1644_s16, %s1916_s16   ;;  %s1558_s15 = sphi %s1642_s15, %s1915_s15   ;;  %s1554_s14 = sphi %s1640_s14, %s1914_s14   ;;  %s1550_s13 = sphi %s1638_s13, %s1913_s13  }
   0xe   : > { %p1672_p1 = scmp.eq.s32.totalorder %s1897_s19, 0  ;;  %p293_p2 = scmp.lt.s32.totalorder %s1570_s18, 3 }
   0xf   : > { %s1903_s1 = sld [smem:[#allocation16_spill]]  ;;  %p1151_p4 = scmp.ge.s32.totalorder %s1570_s18, 2 }
  0x10   : > { %p1680_p3 = pnand %p1146_p0, %p293_p2  ;;  %s1572_s25 = smov [#allocation5]  }
  0x11   : > { %s309_s26 = sshll.u32 %s1572_s25, 4  ;;  %s1906_s6 = sld [smem:[#allocation18_spill]]  ;;  %s310_s26 = int_to_ptr.vmem [resolvable:$true] %s309_s26 }
  0x12   : > { %p1203_p5 = pneg %p1680_p3  ;;  %s1573_s11 = smov [#allocation8]  }
  0x13   : > { %s343_s12 = sshll.u32 %s1573_s11, 4  ;;  %s1907_s4 = sld [smem:[#allocation17_spill]]  ;;  %s344_s12 = int_to_ptr.vmem [resolvable:$true] %s343_s12 }
  0x14   : > { %p1689_p6 = pnand %p1203_p5, %p1672_p1  ;;  %s1574_s19 = smov 128  }
  0x15   : > { %s307_s23 = sshll.u32 %s1903_s1, 4  ;;  %s1575_s28 = smov 8   ;;  %s308_s23 = int_to_ptr.hbm [resolvable:$true] %s307_s23 }
  0x16   : > { %1206 = dma.hbm_to_vmem [thread:$0]  (!%p1689_p6), %s308_s23, 128, %s310_s26, [#allocation6]  }
  0x17   : > { %s341_s30 = sshll.u32 %s1906_s6, 4  ;;  %s1908_s8 = sld [smem:[#allocation19_spill]]  ;;  %s342_s30 = int_to_ptr.hbm [resolvable:$true] %s341_s30 }
  0x18   : > { %1212 = dma.hbm_to_vmem [thread:$0]  (!%p1689_p6), %s342_s30, 512, %s344_s12, [#allocation9], %s1574_s19, %s1574_s19, %s1575_s28  }
  0x19   : > { %s324_s25 = sshll.u32 %s1907_s4, 4  ;;  %s1576_s11 = smov [#allocation7]   ;;  %s325_s25 = int_to_ptr.hbm [resolvable:$true] %s324_s25 }
  0x1a   : > { %s326_s21 = sshll.u32 %s1576_s11, 4  ;;  %s1577_s22 = smov [#allocation10]   ;;  %s327_s21 = int_to_ptr.vmem [resolvable:$true] %s326_s21 }
  0x1b   : > { %1209 = dma.hbm_to_vmem [thread:$0]  (!%p1689_p6), %s325_s25, 512, %s327_s21, [#allocation6], %s1574_s19, %s1574_s19, %s1575_s28  }
  0x1c   : > { %s360_s1 = sshll.u32 %s1577_s22, 4  ;;  %s40_s30 = sadd.s32 1, %s1566_s17  ;;  %s361_s1 = int_to_ptr.vmem [resolvable:$true] %s360_s1 }
  0x1d   : > { %s358_s26 = sshll.u32 %s1908_s8, 4  ;;  %s1145_s12 = sadd.s32 4294967294, %s1570_s18   ;;  %s359_s26 = int_to_ptr.hbm [resolvable:$true] %s358_s26 }
  0x1e   : > { %1215 = dma.hbm_to_vmem [thread:$0]  (!%p1689_p6), %s359_s26, 512, %s361_s1, [#allocation9], %s1574_s19, %s1574_s19, %s1575_s28  }
  0x1f   : > { %p42_p7 = scmp.ge.s32.totalorder %s40_s30, 2  ;;  %s47_s29 = sadd.s32 1, %s1558_s15 }
  0x20   : > { %p54_p8 = scmp.ne.s32.totalorder %s1558_s15, %s1554_s14  ;;  %p55_p9 = scmp.eq.s32.totalorder %s1570_s18, 0 }
  0x21   : > { %s1919_s30 = smov (%p42_p7, %s40_s30), 0  ;;  %p60_p10 = scmp.ne.s32.totalorder %s1554_s14, %s1550_s13 }
  0x22   : > { %s44_s25 = ssub.s32 %s1566_s17, %s1919_s30  ;;  %s1909_s23 = sadd.s32 4294967295, %s1570_s18  }
  0x23   : > { %p280_p11 = scmp.eq.s32.totalorder %s1909_s23, 1  ;;  %p45_p12 = scmp.eq.s32.totalorder %s44_s25, 0 }
  0x24   : > { %p1726_p13 = por %p1672_p1, %p60_p10  ;;  %p286_p2 = scmp.eq.s32.totalorder %s1145_s12, 1 }
  0x25   : > { %p1730_p0 = por %p280_p11, %p54_p8  ;;  %p56_p5 = por %p55_p9, %p54_p8 }
  0x26   : > { %s1735_s27 = scalar_select %p45_p12, %s1558_s15, %s47_s29  }
  0x27   : > { %p1737_p6 = por %p286_p2, %p60_p10  ;;  %s377_s26 = sand.u32 1, %s1558_s15  }
  0x28   : > { %s1153_s11 = sshll.u32 %s1566_s17, 3  ;;  %p1228_p7 = scmp.lt.s32.totalorder %s1570_s18, 2 }
  0x29   : > { %s1152_s21 = sshll.u32 %s377_s26, 3  ;;  %s385_s23 = scalar_lea.hbm %s1886_s0, %s1153_s11 }
  0x2a   : > { %s387_s4 = sshll.u32 %s385_s23, 4  ;;  %s381_s6 = scalar_lea.vmem [#allocation2], %s1152_s21  ;;  %s388_s4 = int_to_ptr.hbm [resolvable:$true] %s387_s4 }
  0x2b   : > { %s389_s8 = sshll.u32 %s381_s6, 4  ;;  %p1217_p11 = pnand %p1228_p7, %p56_p5  ;;  %s390_s8 = int_to_ptr.vmem [resolvable:$true] %s389_s8 }
  0x2c   : > { %s378_s12 = scalar_lea.sflag [#allocation3], %s377_s26  ;;  %398 = sbr.rel (%p1680_p3) target bundleno = 1271 (0x4f7), region = 60 }
  0x2d   : > { %1219 = dma.hbm_to_vmem [thread:$0]  (!%p1217_p11), %s388_s4, 128, %s390_s8, %s378_s12  }
  0x2e   : > { %s1750_s29 = sand.u32 (!%p1680_p3), 1, %s1554_s14  }
  0x2f   : > { %s1155_s22 = sshll.u32 (!%p1680_p3), %s1750_s29, 3  ;;  %s401_s11 = scalar_lea.sflag (!%p1680_p3), [#allocation3], %s1750_s29 }
  0x30   : > { %s404_s21 = scalar_lea.vmem (!%p1680_p3), [#allocation2], %s1155_s22 }
  0x31   : > { %1533 = dma.done.wait (%p1726_p13), %s401_s11, 128  }
  0x32   : > { %1535 = vsyncadd (%p1726_p13), %s401_s11, 4294967168 }
  0x33   : > { %1537 = dma.done.wait (%p1672_p1), [#allocation6], 640  }
  0x34   : > { %1539 = vsyncadd (%p1672_p1), [#allocation6], 4294966656 }
  0x35   : > { %1541 = dma.done.wait (%p1672_p1), [#allocation9], 1024  }
  0x36   : > { %1543 = vsyncadd (%p1672_p1), [#allocation9], 4294966272  ;;  %vm465_vm0 = vcmask 261120   ;;  %v1768_v0 = vld [vmem:[%s404_s21] sm:$0xff]  ;;  %v1578_v2 = vmov 32.0   ;;  %v522_v14 = vld [vmem:[#allocation7 + $0x18] sm:$0xff] }
  0x37   : > { %v466_v1 = vsel %vm465_vm0, %v1768_v0, 0.0  ;;  %1308 = vrcp.f32 %v1578_v2  ;;  %v553_v15 = vld [vmem:[#allocation8 + $0x18] sm:$0xff]  ;;  %v521_v16 = vld [vmem:[#allocation7 + $0x10] sm:$0xff]  ;;  %542 = vmatpush.msra.mxu0 %v522_v14  ;;  %v520_v18 = vld [vmem:[#allocation7 + $0x8] sm:$0xff]  ;;  %vm593_vm8 = vcmask 64512   ;;  %s1579_s23 = smov 112  }
  0x38   : > { %467 = vadd.xlane.f32.xlu0 %v466_v1  ;;  %570 = vmatpush.msra.mxu1 %v553_v15  ;;  %v552_v17 = vld [vmem:[#allocation8 + $0x10] sm:$0xff]  ;;  %v551_v19 = vld [vmem:[#allocation8 + $0x8] sm:$0xff]  ;;  %v519_v20 = vld [vmem:[#allocation7] sm:$0xff]  ;;  %s1580_s12 = smov 120   ;;  %s1581_s11 = smov 104  }
  0x39   : > { %543 = vmatpush.msra.mxu0 %v521_v16  ;;  %v550_v21 = vld [vmem:[#allocation8] sm:$0xff]  ;;  %v1303_v39 = vld [vmem:[%s1888_s2] ss:$0 sm:$0xff]  ;;  %v690_v63 = vld [vmem:[#allocation5] sm:$0xff]  ;;  %s1582_s21 = smov 96   ;;  %s1180_s4 = sshll.u32 %s1562_s16, 3 }
  0x3a   : > { %571 = vmatpush.msra.mxu1 %v552_v17  ;;  %v1304_v46 = vld [vmem:[%s1889_s3] ss:$0 sm:$0xff]  ;;  %vm691_vm9 = vcmp.eq.f32.partialorder %v690_v63, 0.0  ;;  %s1020_s20 = scalar_lea.hbm %s1896_s10, %s1180_s4  ;;  %s461_s16 = scalar_lea.vmem [#allocation11], %s1155_s22 }
  0x3b   : > { %544 = vmatpush.msra.mxu0 %v520_v18  ;;  %v1305_v50 = vld [vmem:[%s1891_s5] ss:$0 sm:$0xff]  ;;  %s1022_s26 = sshll.u32 %s461_s16, 4  ;;  %s1024_s25 = sshll.u32 %s1020_s20, 4  ;;  %s1023_s26 = int_to_ptr.vmem [resolvable:$true] %s1022_s26  ;;  %s1025_s25 = int_to_ptr.hbm [resolvable:$true] %s1024_s25 }
  0x3c   : > { %572 = vmatpush.msra.mxu1 %v551_v19  ;;  %v1306_v51 = vld [vmem:[%s1893_s7] ss:$0 sm:$0xff]  ;;  %s1500_s22 = scalar_lea.hbm %s1896_s10, 16 }
  0x3d   : > { %v1309_v3 = vpop.eup %1308  ;;  %545 = vmatpush.msra.mxu0 %v519_v20 }
  0x3e   : > { %v470_v4 = vmul.f32 32.0, %v1309_v3  ;;  %vm474_vm1 = vweird.f32 %v1309_v3  ;;  %573 = vmatpush.msra.mxu1 %v550_v21 }
  0x40   : > { %v471_v5 = vsub.f32 1.0, %v470_v4 }
  0x42   : > { %v472_v6 = vmul.f32 %v1309_v3, %v471_v5 }
  0x44   : > { %v473_v7 = vadd.f32 %v1309_v3, %v472_v6 }
  0x46   : > { %v475_v8 = vsel %vm474_vm1, %v1309_v3, %v473_v7 }
  0xab   : > { %v468_v9 = vpop.xlane.xlu0 %467 }
  0xac   : > { %v476_v10 = vmul.f32 %v475_v8, %v468_v9 }
  0xae   : > { %v477_v11 = vsub.f32 %v1768_v0, %v476_v10 }
  0xb0   : > { %v478_v12 = vmul.f32 %v477_v11, %v477_v11  ;;  %v498_v44 = vmul.f32 %v1303_v39, %v477_v11 }
  0xb2   : > { %v479_v13 = vsel %vm465_vm0, %v478_v12, 0.0 }
  0xb3   : > { %480 = vadd.xlane.f32.xlu0 %v479_v13 }
 0x126   : > { %v481_v22 = vpop.xlane.xlu0 %480 }
 0x127   : > { %v482_v23 = vmul.f32 0.032258064, %v481_v22 }
 0x129   : > { %1310 = vrsqrt.f32 %v482_v23  ;;  %vm490_vm2 = vcmp.eq.f32.partialorder %v482_v23, inf  ;;  %v493_v31 = vand.u32 2147483648, %v482_v23  ;;  %vm492_vm3 = vcmp.eq.f32.partialorder %v482_v23, 0.0 }
 0x12f   : > { %v1311_v24 = vpop.eup %1310 }
 0x130   : > { %v484_v25 = vmul.f32 %v1311_v24, %v482_v23 }
 0x132   : > { %v485_v26 = vmul.f32 %v1311_v24, %v484_v25 }
 0x134   : > { %v486_v27 = vmul.f32 0.5, %v485_v26 }
 0x136   : > { %v487_v28 = vsub.f32 1.5, %v486_v27 }
 0x138   : > { %v488_v29 = vmul.f32 %v1311_v24, %v487_v28 }
 0x13a   : > { %v489_v30 = vmul.f32 %v488_v29, %v482_v23 }
 0x13c   : > { %v491_v32 = vsel %vm490_vm2, %v482_v23, %v489_v30 }
 0x13d   : > { %v494_v33 = vsel %vm492_vm3, %v493_v31, %v491_v32 }
 0x13e   : > { %v499_v34 = vadd.f32 1e-06, %v494_v33 }
 0x140   : > { %1312 = vrcp.f32 %v499_v34  ;;  %v511_v38 = vand.u32 2147483648, %v499_v34  ;;  %v509_v41 = vand.u32 2147483647, %v499_v34  ;;  %vm505_vm5 = vweird.f32 %v499_v34 }
 0x142   : > { %v512_v43 = vor.u32 1.1754944e-38, %v511_v38  ;;  %vm510_vm7 = vcmp.eq.f32.partialorder %v509_v41, 8.507059e+37 }
 0x146   : > { %v1313_v35 = vpop.eup %1312 }
 0x147   : > { %v501_v36 = vmul.f32 %v1313_v35, %v499_v34  ;;  %vm506_vm4 = vweird.f32 %v1313_v35 }
 0x148   : > { %vm507_vm6 = vmor %vm505_vm5, %vm506_vm4 }
 0x149   : > { %v502_v37 = vsub.f32 1.0, %v501_v36 }
 0x14b   : > { %v503_v40 = vmul.f32 %v1313_v35, %v502_v37 }
 0x14d   : > { %v504_v42 = vadd.f32 %v1313_v35, %v503_v40 }
 0x14f   : > { %v508_v45 = vsel %vm507_vm6, %v1313_v35, %v504_v42 }
 0x150   : > { %v513_v47 = vsel %vm510_vm7, %v512_v43, %v508_v45 }
 0x151   : > { %v514_v48 = vmul.f32 %v513_v47, %v498_v44 }
 0x153   : > { %v518_v49 = vadd.f32 %v1304_v46, %v514_v48 }
 0x155   : > { %1161 = vmatmul.msk.f32.vlgmr.msra.gmra.mxu0 %vm465_vm0, %v518_v49  ;;  %1162 = vmatmul.msk.f32.vlgmr.msra.gmra.mxu1 %vm465_vm0, %v518_v49 }
 0x1d2   : > { %v547_v52 = vpop.f32.mrf.mxu0  ;;  %v575_v53 = vpop.f32.mrf.mxu1 }
 0x1d3   : > { %v548_v54 = vadd.f32 %v1305_v50, %v547_v52  ;;  %v1788_v55 = vadd.f32 %v1306_v51, %v575_v53 }
 0x1d5   : > { %v578_v56 = vmul.f32 0.35355338, %v548_v54  ;;  %589 = vrot.lane.b32.xlu2 %v1788_v55, %s1579_s23  ;;  %587 = vrot.lane.b32.xlu1 %v1788_v55, %s1580_s12 }
 0x1d6   : > { %1163 = vmatpush.xpose.msk.msra.mxu2 %vm593_vm8, %v1788_v55 }
 0x1d7   : > { %582 = vrot.lane.b32.xlu0 %v578_v56, %s1579_s23  ;;  %s1009_s23 = scalar_lea.sflag [#allocation4], %s1750_s29 }
 0x1d9   : > { %1164 = vmatmul.msk.f32.vlgmr.msra.gmra.mxu2 %vm593_vm8, %v578_v56 }
 0x1dd   : > { %591 = vrot.lane.b32.xlu2 %v1788_v55, %s1581_s11  ;;  %580 = vrot.lane.b32.xlu1 %v578_v56, %s1580_s12  ;;  %s1494_s12 = sshra.s32 %s1025_s25, 4  ;;  %s1495_s12 = int_to_ptr.hbm [resolvable:$true] %s1494_s12 }
 0x1de   : > { %p1501_p9 = scmp.lt.s32.totalorder %s1495_s12, %s1896_s10 }
 0x1e5   : > { %584 = vrot.lane.b32.xlu1 %v578_v56, %s1581_s11  ;;  %s1496_s11 = scalar_lea.hbm %s1495_s12, 8 }
 0x1e6   : > { %p1497_p1 = scmp.ne.s32.totalorder %s1495_s12, %s1496_s11  ;;  %p1502_p10 = scmp.lt.s32.totalorder %s1500_s22, %s1496_s11 }
 0x1e8   : > { %p1498_p3 = pnand %p1497_p1, %p1730_p0  ;;  %p1503_p12 = por %p1502_p10, %p1501_p9 }
 0x1ea   : > { %p1499_p8 = pneg %p1498_p3 }
 0x1ec   : > { %p1504_p13 = pnand %p1503_p12, %p1499_p8 }
 0x22f   : > { %v590_v57 = vpop.permute.xlu2 %589 }
 0x230   : > { %1167 = vmatpush.xpose.msk.msrb.mxu2 %vm593_vm8, %v590_v57 }
 0x237   : > { %v592_v59 = vpop.permute.xlu2 %591 }
 0x238   : > { %v1293_v4 = vpack.i.bf16 %v592_v59, %v590_v57 }
 0x247   : > { %v1797_v58 = vpop.permute.xlu1 %587 }
 0x248   : > { %1165 = vmatpush.xpose.msk.msra.mxu3 %vm593_vm8, %v1797_v58  ;;  %v1298_v37 = vpack.i.bf16 %v1797_v58, %v1788_v55 }
 0x249   : > { %v583_v60 = vpop.permute.xlu0 %582 }
 0x24a   : > { %1168 = vmatmul.msk.f32.vlgmr.msrb.gmra.mxu2 %vm593_vm8, %v583_v60 }
 0x24c   : > { %1169 = vmatpush.xpose.msk.msrb.mxu3 %vm593_vm8, %v592_v59 }
 0x24f   : > { %v581_v61 = vpop.permute.xlu1 %580 }
 0x250   : > { %1166 = vmatmul.msk.f32.vlgmr.msra.gmra.mxu3 %vm593_vm8, %v581_v61 }
 0x257   : > { %v585_v62 = vpop.permute.xlu1 %584 }
 0x258   : > { %1170 = vmatmul.msk.f32.vlgmr.msrb.gmra.mxu3 %vm593_vm8, %v585_v62 }
 0x25c   : > { %v615_v1 = vpop.f32.mrf.mxu2 }
 0x25d   : > { %v694_v2 = vsel %vm691_vm9, -1e+09, %v615_v1 }
 0x25e   : > { %v698_v3 = vsel %vm593_vm8, %v694_v2, -inf }
 0x25f   : > { %699 = vmax.xlane.f32.xlu0 %v698_v3 }
 0x273   : > { %1294 = vrot.lane.b32.xlu0 %v1293_v4, %s1582_s21 }
 0x2cd   : > { %v663_v5 = vpop.f32.mrf.mxu2 }
 0x2ce   : > { %v696_v6 = vsel %vm691_vm9, -1e+09, %v663_v5 }
 0x2cf   : > { %v704_v7 = vsel %vm593_vm8, %v696_v6, -inf }
 0x2d0   : > { %705 = vmax.xlane.f32.xlu2 %v704_v7 }
 0x2d2   : > { %v700_v8 = vpop.xlane.xlu0 %699 }
 0x2d3   : > { %v710_v9 = vsub.f32 %v694_v2, %v700_v8  ;;  %v639_v10 = vpop.f32.mrf.mxu3 }
 0x2d4   : > { %v695_v11 = vsel %vm691_vm9, -1e+09, %v639_v10 }
 0x2d5   : > { %v714_v12 = vmul.f32 1.442695, %v710_v9  ;;  %v701_v13 = vsel %vm593_vm8, %v695_v11, -inf }
 0x2d7   : > { %1314 = vpow2.f32 %v714_v12 }
 0x2d8   : > { %702 = vmax.xlane.f32.xlu2 %v701_v13 }
 0x2db   : > { %v687_v14 = vpop.f32.mrf.mxu3 }
 0x2dc   : > { %v697_v15 = vsel %vm691_vm9, -1e+09, %v687_v14 }
 0x2dd   : > { %v1315_v16 = vpop.eup %1314  ;;  %v707_v17 = vsel %vm593_vm8, %v697_v15, -inf }
 0x2de   : > { %708 = vmax.xlane.f32.xlu1 %v707_v17  ;;  %v722_v18 = vsel %vm593_vm8, %v1315_v16, 0.0 }
 0x2e0   : > { %723 = vadd.xlane.f32.xlu2 %v722_v18 }
 0x2e5   : > { %v1295_v19 = vpop.permute.xlu0 %1294 }
 0x2e6   : > { %v1297_v20 = vunpack.i.h.bf16 %v1295_v19  ;;  %v1296_v21 = vunpack.i.l.bf16 %v1295_v19 }
 0x2e8   : > { %867 = vmatpush.msra.mxu2 %v1296_v21  ;;  %893 = vmatpush.msra.mxu3 %v1297_v20 }
 0x343   : > { %v706_v22 = vpop.xlane.xlu2 %705 }
 0x344   : > { %v712_v23 = vsub.f32 %v696_v6, %v706_v22 }
 0x346   : > { %v718_v24 = vmul.f32 1.442695, %v712_v23 }
 0x348   : > { %1316 = vpow2.f32 %v718_v24 }
 0x34b   : > { %v703_v27 = vpop.xlane.xlu2 %702 }
 0x34c   : > { %v711_v30 = vsub.f32 %v695_v11, %v703_v27  ;;  %v900_v27 = vld [vmem:[#allocation10 + $0x10] sm:$0xff] }
 0x34d   : > { %966 = vmatpush.msrb.mxu2 %v900_v27 }
 0x34e   : > { %v1317_v25 = vpop.eup %1316  ;;  %v716_v32 = vmul.f32 1.442695, %v711_v30 }
 0x34f   : > { %v728_v26 = vsel %vm593_vm8, %v1317_v25, 0.0 }
 0x350   : > { %729 = vadd.xlane.f32.xlu2 %v728_v26  ;;  %v898_v26 = vld [vmem:[#allocation10] sm:$0xff] }
 0x351   : > { %v709_v28 = vpop.xlane.xlu1 %708 }
 0x352   : > { %v713_v29 = vsub.f32 %v697_v15, %v709_v28  ;;  %v901_v28 = vld [vmem:[#allocation10 + $0x18] sm:$0xff] }
 0x353   : > { %v724_v38 = vpop.xlane.xlu2 %723  ;;  %989 = vmatpush.msrb.mxu3 %v901_v28 }
 0x354   : > { %v720_v31 = vmul.f32 1.442695, %v713_v29  ;;  %v745_v45 = vand.u32 2147483648, %v724_v38  ;;  %vm739_vm11 = vweird.f32 %v724_v38  ;;  %v743_v46 = vand.u32 2147483647, %v724_v38  ;;  %v899_v29 = vld [vmem:[#allocation10 + $0x8] sm:$0xff] }
 0x356   : > { %1318 = vpow2.f32 %v720_v31  ;;  %v746_v48 = vor.u32 1.1754944e-38, %v745_v45  ;;  %vm744_vm13 = vcmp.eq.f32.partialorder %v743_v46, 8.507059e+37  ;;  %v1307_v45 = vld [vmem:[%s1895_s9] ss:$0 sm:$0xff] }
 0x357   : > { %1320 = vpow2.f32 %v716_v32 }
 0x358   : > { %1322 = vrcp.f32 %v724_v38 }
 0x35c   : > { %v1816_v33 = vpop.eup %1318 }
 0x35d   : > { %v731_v34 = vsel %vm593_vm8, %v1816_v33, 0.0  ;;  %v1820_v35 = vpop.eup %1320 }
 0x35e   : > { %732 = vadd.xlane.f32.xlu1 %v731_v34  ;;  %v725_v36 = vsel %vm593_vm8, %v1820_v35, 0.0  ;;  %v1323_v39 = vpop.eup %1322 }
 0x35f   : > { %v735_v40 = vmul.f32 %v1323_v39, %v724_v38  ;;  %vm740_vm10 = vweird.f32 %v1323_v39 }
 0x360   : > { %vm741_vm12 = vmor %vm739_vm11, %vm740_vm10 }
 0x361   : > { %v736_v41 = vsub.f32 1.0, %v735_v40 }
 0x363   : > { %v737_v42 = vmul.f32 %v1323_v39, %v736_v41 }
 0x365   : > { %v738_v43 = vadd.f32 %v1323_v39, %v737_v42 }
 0x366   : > { %726 = vadd.xlane.f32.xlu1 %v725_v36 }
 0x367   : > { %v742_v47 = vsel %vm741_vm12, %v1323_v39, %v738_v43 }
 0x368   : > { %1299 = vrot.lane.b32.xlu2 %v1298_v37, %s1582_s21  ;;  %v747_v50 = vsel %vm744_vm13, %v746_v48, %v742_v47 }
 0x369   : > { %v790_v56 = vmul.f32 %v1315_v16, %v747_v50 }
 0x3c3   : > { %v730_v44 = vpop.xlane.xlu2 %729 }
 0x3c4   : > { %1324 = vrcp.f32 %v730_v44  ;;  %v773_v57 = vand.u32 2147483648, %v730_v44  ;;  %v771_v59 = vand.u32 2147483647, %v730_v44  ;;  %vm767_vm15 = vweird.f32 %v730_v44 }
 0x3c6   : > { %v774_v62 = vor.u32 1.1754944e-38, %v773_v57  ;;  %vm772_vm2 = vcmp.eq.f32.partialorder %v771_v59, 8.507059e+37 }
 0x3ca   : > { %v1325_v49 = vpop.eup %1324 }
 0x3cb   : > { %v763_v51 = vmul.f32 %v1325_v49, %v730_v44  ;;  %v1300_v52 = vpop.permute.xlu2 %1299  ;;  %vm768_vm14 = vweird.f32 %v1325_v49 }
 0x3cc   : > { %v1302_v53 = vunpack.i.h.bf16 %v1300_v52  ;;  %v1301_v54 = vunpack.i.l.bf16 %v1300_v52  ;;  %vm769_vm1 = vmor %vm767_vm15, %vm768_vm14 }
 0x3cd   : > { %v764_v55 = vsub.f32 1.0, %v763_v51 }
 0x3ce   : > { %815 = vmatpush.msrb.mxu0 %v1301_v54  ;;  %841 = vmatpush.msrb.mxu1 %v1302_v53 }
 0x3cf   : > { %v765_v58 = vmul.f32 %v1325_v49, %v764_v55  ;;  %1171 = vmatmul.msk.f32.vlgmr.msrb.gmra.mxu0 %vm593_vm8, %v790_v56 }
 0x3d0   : > { %920 = vmatpush.msra.mxu0 %v898_v26  ;;  %943 = vmatpush.msra.mxu1 %v899_v29 }
 0x3d1   : > { %v766_v60 = vadd.f32 %v1325_v49, %v765_v58  ;;  %v733_v61 = vpop.xlane.xlu1 %732 }
 0x3d2   : > { %1326 = vrcp.f32 %v733_v61  ;;  %v787_v7 = vand.u32 2147483648, %v733_v61  ;;  %v785_v9 = vand.u32 2147483647, %v733_v61  ;;  %vm781_vm4 = vweird.f32 %v733_v61 }
 0x3d3   : > { %v770_v63 = vsel %vm769_vm1, %v1325_v49, %v766_v60 }
 0x3d4   : > { %v775_v1 = vsel %vm772_vm2, %v774_v62, %v770_v63  ;;  %v788_v12 = vor.u32 1.1754944e-38, %v787_v7  ;;  %vm786_vm6 = vcmp.eq.f32.partialorder %v785_v9, 8.507059e+37 }
 0x3d5   : > { %v792_v2 = vmul.f32 %v1317_v25, %v775_v1 }
 0x3d7   : > { %1173 = vmatmul.msk.f32.vlgmr.msra.gmra.mxu2 %vm593_vm8, %v792_v2 }
 0x3d8   : > { %v1327_v3 = vpop.eup %1326 }
 0x3d9   : > { %v777_v4 = vmul.f32 %v1327_v3, %v733_v61  ;;  %v727_v5 = vpop.xlane.xlu1 %726  ;;  %vm782_vm3 = vweird.f32 %v1327_v3 }
 0x3da   : > { %1328 = vrcp.f32 %v727_v5  ;;  %vm783_vm5 = vmor %vm781_vm4, %vm782_vm3  ;;  %v759_v18 = vand.u32 2147483648, %v727_v5  ;;  %v757_v20 = vand.u32 2147483647, %v727_v5  ;;  %vm753_vm9 = vweird.f32 %v727_v5 }
 0x3db   : > { %v778_v6 = vsub.f32 1.0, %v777_v4 }
 0x3dc   : > { %v760_v22 = vor.u32 1.1754944e-38, %v759_v18  ;;  %vm758_vm11 = vcmp.eq.f32.partialorder %v757_v20, 8.507059e+37 }
 0x3dd   : > { %v779_v8 = vmul.f32 %v1327_v3, %v778_v6 }
 0x3df   : > { %v780_v10 = vadd.f32 %v1327_v3, %v779_v8 }
 0x3e0   : > { %v1329_v11 = vpop.eup %1328 }
 0x3e1   : > { %v784_v13 = vsel %vm783_vm5, %v1327_v3, %v780_v10  ;;  %v749_v14 = vmul.f32 %v1329_v11, %v727_v5  ;;  %vm754_vm7 = vweird.f32 %v1329_v11 }
 0x3e2   : > { %v789_v15 = vsel %vm786_vm6, %v788_v12, %v784_v13  ;;  %vm755_vm10 = vmor %vm753_vm9, %vm754_vm7 }
 0x3e3   : > { %v750_v16 = vsub.f32 1.0, %v749_v14  ;;  %v793_v17 = vmul.f32 %v1816_v33, %v789_v15 }
 0x3e5   : > { %v751_v19 = vmul.f32 %v1329_v11, %v750_v16  ;;  %1174 = vmatmul.msk.f32.vlgmr.msra.gmra.mxu3 %vm593_vm8, %v793_v17 }
 0x3e7   : > { %v752_v21 = vadd.f32 %v1329_v11, %v751_v19 }
 0x3e9   : > { %v756_v23 = vsel %vm755_vm10, %v1329_v11, %v752_v21 }
 0x3ea   : > { %v761_v24 = vsel %vm758_vm11, %v760_v22, %v756_v23 }
 0x3eb   : > { %v791_v25 = vmul.f32 %v1820_v35, %v761_v24 }
 0x3ed   : > { %1172 = vmatmul.msk.f32.vlgmr.msrb.gmra.mxu1 %vm593_vm8, %v791_v25 }
 0x44c   : > { %v817_v30 = vpop.f32.mrf.mxu0 }
 0x44d   : > { %1175 = vmatmul.msk.f32.vlgmr.msra.gmra.mxu0 %vm593_vm8, %v817_v30 }
 0x45a   : > { %v869_v31 = vpop.f32.mrf.mxu2 }
 0x45b   : > { %1177 = vmatmul.msk.f32.vlgmr.msrb.gmra.mxu2 %vm593_vm8, %v869_v31 }
 0x468   : > { %v895_v32 = vpop.f32.mrf.mxu3 }
 0x469   : > { %1178 = vmatmul.msk.f32.vlgmr.msrb.gmra.mxu3 %vm593_vm8, %v895_v32 }
 0x46a   : > { %v843_v33 = vpop.f32.mrf.mxu1 }
 0x46b   : > { %1176 = vmatmul.msk.f32.vlgmr.msra.gmra.mxu1 %vm593_vm8, %v843_v33 }
 0x4ca   : > { %v922_v34 = vpop.f32.mrf.mxu0 }
 0x4cb   : > { %v994_v37 = vsel %vm465_vm0, %v922_v34, 0.0 }
 0x4de   : > { %v968_v35 = vpop.f32.mrf.mxu2 }
 0x4df   : > { %v997_v40 = vsel %vm465_vm0, %v968_v35, 0.0 }
 0x4e8   : > { %v945_v36 = vpop.f32.mrf.mxu1 }
 0x4e9   : > { %v995_v38 = vsel %vm465_vm0, %v945_v36, 0.0 }
 0x4ea   : > { %v996_v39 = vadd.f32 %v995_v38, %v994_v37 }
 0x4ec   : > { %v991_v41 = vpop.f32.mrf.mxu3  ;;  %v998_v42 = vadd.f32 %v997_v40, %v996_v39 }
 0x4ed   : > { %v999_v43 = vsel %vm465_vm0, %v991_v41, 0.0 }
 0x4ee   : > { %v1000_v44 = vadd.f32 %v999_v43, %v998_v42 }
 0x4f0   : > { %v1001_v46 = vadd.f32 %v1000_v44, %v1768_v0 }
 0x4f2   : > { %v1006_v47 = vadd.f32 %v1307_v45, %v1001_v46 }
 0x4f4   : > { %1007 = vst.msk [vmem:[%s461_s16] sm:$0xff] %vm465_vm0, %v1006_v47 }
 0x4f5   : > { %1507 = shalt.err (!%p1504_p13)
}
 0x4f6   : > { %1201 = dma.vmem_to_hbm [thread:$0]  (%p1730_p0), %s1023_s26, 128, %s1025_s25, %s1009_s23  }
 0x4f7 PF: > { %s1036_s29 = sand.u32 1, %s1550_s13   ;;  %p1221_p2 = pnand %p1151_p4, %p1737_p6 }
 0x4f8   : > { %s1037_s20 = scalar_lea.sflag [#allocation4], %s1036_s29 }
 0x4f9   : > { %p1222_p5 = pneg %p1221_p2 }
 0x4fb   : > { %1545 = dma.done.wait (%p1222_p5), %s1037_s20, 128  }
 0x4fc   : > { %1547 = vsyncadd (%p1222_p5), %s1037_s20, 4294967168  ;;  %s28_s18 = sadd.s32 1, %s1570_s18   ;;  %s1913_s13 = smov %s1554_s14 }
 0x4fd   : > { %p25_p7 = scmp.ge.s32.totalorder %s28_s18, 4   ;;  %s1914_s14 = smov %s1558_s15 }
 0x4fe   : > { %s1915_s15 = smov %s1735_s27  ;;  %s1916_s16 = smov %s1566_s17 }
 0x4ff   : > { %s1917_s17 = smov %s1919_s30  ;;  %27 = sbr.rel (!%p25_p7) target bundleno = 13 (0xd), region = 122 }
 0x504   :  { %1043 = vsyncpa [#allocation3], 1 }
 0x505   :  { %1045 = vsyncpa [#allocation3 + $0x1], 1 }
 0x506   :  { %1046 = vsyncpa [#allocation6], 1 }
 0x507   :  { %1047 = vsyncpa [#allocation9], 1 }
 0x508   :  { %1048 = vsyncpa [#allocation4], 1 }
 0x509   :  { %1050 = vsyncpa [#allocation4 + $0x1], 1 }

</bundles_post_ra>
